<compile_context>
chip_gen: v5e
topology: v5e:2x2
jax: 0.10.0
libtpu: 0.0.40
codegen_flags: <defaults>
</compile_context>

<pallas_src>
import functools

import jax
import jax.numpy as jnp
from jax.experimental import pallas as pl
from jax.experimental.pallas import tpu as pltpu


_LANE = 128        # vreg lane width
_TM_MAX = 1024     # M tile upper bound
_TO_MAX = 1024     # output-channel tile upper bound
_TK_TILE = 512     # K tile when the reduction must be tiled


def _round_up(x, m):
    return (x + m - 1) // m * m


def _tpu_budgets():
    """Generation-aware VMEM sizing.

    v5e/v6e: 128 MiB VMEM, 1 TensorCore.  v7x: 64 MiB VMEM per TC, 2 TCs per
    chip (so the parallel M axis should have >= 2 blocks)."""
    vmem_cap = 64 << 20          # conservative default (v7x-sized)
    n_cores = 1
    try:
        info = pltpu.get_tpu_info()
        vmem_cap = int(getattr(info, "vmem_capacity_bytes", vmem_cap))
        for attr in ("num_cores", "core_count", "tensorcore_count"):
            v = getattr(info, attr, None)
            if v:
                n_cores = int(v)
                break
    except Exception:            # interpret mode / older jax
        pass
    n_cores = max(1, min(2, n_cores))
    if n_cores <= 1 and vmem_cap <= (64 << 20):
        n_cores = 2              # v7x heuristic: 64 MiB/TC <=> 2 TCs per chip
    tile_budget = int(0.40 * vmem_cap)      # per-call tile-footprint target
    vmem_limit_cap = int(0.65 * vmem_cap)   # hard scoped-VMEM clamp
    tk_full_max = 6144 if vmem_cap >= (96 << 20) else 2048
    return vmem_cap, n_cores, tile_budget, vmem_limit_cap, tk_full_max


def _choose_o_tiling(O):
    """Return (O_w, tO, nO): stored output width, O tile, #O tiles."""
    O_128 = _round_up(O, _LANE)
    if O <= _LANE or (O_128 - O) * 4 > O:
        # Tiny / badly-padding C_out: keep exact width (full-extent block).
        # Masked stores cost far less than 128/O write inflation plus a
        # post-kernel slice pass.
        return O, O, 1
    if O_128 <= _TO_MAX:
        return O_128, O_128, 1
    # Tile O: largest multiple-of-128 divisor of O_128 that is <= _TO_MAX.
    for cand in range(_TO_MAX // _LANE, 0, -1):
        t = cand * _LANE
        if O_128 % t == 0:
            return O_128, t, O_128 // t
    return O_128, _LANE, O_128 // _LANE


# ----------------------------------------------------------------------------
# Matmul kernels:  out = A @ B + bias   (A: activations, B: weight matrix)
# ----------------------------------------------------------------------------
def _mm_bias_kernel(a_ref, b_ref, bias_ref, o_ref):
    """Un-tiled-K fast path: no accumulator scratch, no RMW."""
    o_ref[...] = (
        jnp.dot(a_ref[...], b_ref[...], preferred_element_type=jnp.float32)
        + bias_ref[...]).astype(o_ref.dtype)


def _mm_bias_acc_kernel(a_ref, b_ref, bias_ref, o_ref, acc_ref):
    """K-tiled path: f32 VMEM accumulator; bias folded into the k==0 init."""
    k = pl.program_id(2)

    @pl.when(k == 0)
    def _():
        acc_ref[...] = jnp.broadcast_to(bias_ref[...], acc_ref.shape)

    acc_ref[...] += jnp.dot(a_ref[...], b_ref[...],
                            preferred_element_type=jnp.float32)

    @pl.when(k == pl.num_programs(2) - 1)
    def _():
        o_ref[...] = acc_ref[...].astype(o_ref.dtype)


def _pallas_matmul_bias(a, b, bias):
    """a: (M, K), b: (K, O) (bf16 recommended), bias: (O,) f32 -> (M, O) f32."""
    M, K = a.shape
    _, O = b.shape
    ab = a.dtype.itemsize

    _, n_cores, budget, vmem_cap_limit, tk_full_max = _tpu_budgets()

    O_w, tO, nO = _choose_o_tiling(O)
    if O_w != O:
        b = jnp.pad(b, ((0, 0), (0, O_w - O)))
        bias = jnp.pad(bias, (0, O_w - O))
    bias_row = bias.reshape(1, O_w).astype(jnp.float32)

    def footprint(tm, tk, nk):
        return (2 * tm * tk * ab                  # A double-buffer
                + 2 * tk * tO * ab                # B double-buffer
                + 2 * tO * 4                      # bias double-buffer
                + (tm * tO * 4 if nk > 1 else 0)  # accumulator scratch
                + 2 * tm * tO * 4)                # output double-buffer

    # K tiling only when the un-tiled footprint cannot fit the budget.
    if K <= tk_full_max and footprint(256, K, 1) <= budget:
        tk, nk = K, 1
    else:
        tk = min(_TK_TILE, _round_up(K, _LANE))
        K_pad = _round_up(K, tk)
        if K_pad != K:                       # zero pad is a no-op in the sum
            a = jnp.pad(a, ((0, 0), (0, K_pad - K)))
            b = jnp.pad(b, ((0, K_pad - K), (0, 0)))
        K = K_pad
        nk = K // tk

    # M tile: as large as the budget allows; split across TensorCores on v7x.
    tm = min(_TM_MAX, _round_up(M, 256))
    while tm > 256 and footprint(tm, tk, nk) > budget:
        tm -= 256
    if n_cores > 1 and M > 2 * 256:
        tm = min(tm, max(256, _round_up(pl.cdiv(M, n_cores), 256)))
    if tm >= M:
        tm = M                               # single full-extent M block
    grid_m = pl.cdiv(M, tm)                  # ragged last block: Pallas clips

    vmem_need = footprint(tm, tk, nk)
    vmem_limit = int(min(vmem_cap_limit, max(32 << 20, 2 * vmem_need)))
    vmem_limit = int(min(vmem_cap_limit, max(vmem_limit, vmem_need + (4 << 20))))

    a_reads = nO
    b_reads = grid_m if (nk > 1 or nO > 1) else 1
    cost = pl.CostEstimate(
        flops=2 * M * K * O_w,
        transcendentals=0,
        bytes_accessed=(M * K * ab * a_reads + K * O_w * ab * b_reads
                        + M * O_w * 4 + O_w * 4))

    if nk == 1:
        grid = (grid_m, nO)
        in_specs = [
            pl.BlockSpec((tm, tk), lambda i, j: (i, 0)),    # activations
            pl.BlockSpec((tk, tO), lambda i, j: (0, j)),    # weights
            pl.BlockSpec((1, tO), lambda i, j: (0, j)),     # bias row
        ]
        out_spec = pl.BlockSpec((tm, tO), lambda i, j: (i, j))
        kernel = _mm_bias_kernel
        scratch = []
        dims = ("parallel", "parallel")
    else:
        grid = (grid_m, nO, nk)                             # reduction last
        in_specs = [
            pl.BlockSpec((tm, tk), lambda i, j, k: (i, k)),
            pl.BlockSpec((tk, tO), lambda i, j, k: (k, j)),
            pl.BlockSpec((1, tO), lambda i, j, k: (0, j)),
        ]
        out_spec = pl.BlockSpec((tm, tO), lambda i, j, k: (i, j))
        kernel = _mm_bias_acc_kernel
        scratch = [pltpu.VMEM((tm, tO), jnp.float32)]
        dims = ("parallel", "parallel", "arbitrary")

    out = pl.pallas_call(
        kernel,
        out_shape=jax.ShapeDtypeStruct((M, O_w), jnp.float32),
        grid_spec=pltpu.PrefetchScalarGridSpec(
            num_scalar_prefetch=0,
            grid=grid,
            in_specs=in_specs,
            out_specs=out_spec,
            scratch_shapes=scratch),
        compiler_params=pltpu.CompilerParams(
            dimension_semantics=dims,
            vmem_limit_bytes=vmem_limit),
        cost_estimate=cost,
    )(a, b, bias_row)

    if O_w != O:
        out = out[:, :O]
    return out


# ----------------------------------------------------------------------------
# Fused conv kernel (kh*kw tap loop inside the kernel — no HBM im2col).
# One grid point = one image x one C_out tile.
# ----------------------------------------------------------------------------
def _fused_conv_kernel(x_ref, w_ref, bias_ref, o_ref, *, kh, kw, ho, wo):
    c = x_ref.shape[-1]
    t_o = o_ref.shape[-1]
    acc = jnp.broadcast_to(bias_ref[...], (ho * wo, t_o)).astype(jnp.float32)
    for i in range(kh):                       # static tap loop, unrolled
        for j in range(kw):
            patch = x_ref[0, i:i + ho, j:j + wo, :]       # (ho, wo, c) VMEM read
            a = patch.reshape(ho * wo, c)                 # lanes (c) untouched
            acc = acc + jnp.dot(a, w_ref[i, j],
                                preferred_element_type=jnp.float32)
    o_ref[0] = acc.reshape(ho, wo, t_o).astype(o_ref.dtype)


# ----------------------------------------------------------------------------
# SNConv2d forward.  NHWC is the primary entry point (no transpose passes);
# the NCHW wrapper below only exists for PyTorch parity.
# ----------------------------------------------------------------------------
def sn_conv2d_forward_nhwc(x_nhwc, weight, bias=None, *, stride=1, padding=0,
                           compute_dtype=jnp.bfloat16):
    """x: (N, H, W, C) NHWC.  weight: PyTorch OIHW (C_out, C_in, kh, kw).
    bias: (C_out,) or None.  Returns (N, Ho, Wo, C_out) float32.
    compute_dtype=jnp.float32 gives exact PyTorch-style f32 math."""
    N, H, W, C = x_nhwc.shape
    O, C_in, kh, kw = weight.shape
    assert C_in == C, (C_in, C)
    sh = sw = int(stride)
    ph = pw = int(padding)
    Ho = (H + 2 * ph - kh) // sh + 1
    Wo = (W + 2 * pw - kw) // sw + 1

    if bias is None:
        bias = jnp.zeros((O,), jnp.float32)
    bias = bias.astype(jnp.float32)

    # Tiny weight re-layout OIHW -> (kh, kw, C_in, C_out) to match NHWC order.
    w_hwio = jnp.transpose(weight, (2, 3, 1, 0)).astype(compute_dtype)

    # ---- 1x1 conv (module default): pure reshape -> matmul, no im2col -----
    if kh == 1 and kw == 1:
        x = x_nhwc
        if ph or pw:
            x = jnp.pad(x, ((0, 0), (ph, ph), (pw, pw), (0, 0)))
        if sh != 1 or sw != 1:
            x = x[:, ::sh, ::sw, :]
        a = x.reshape(N * Ho * Wo, C).astype(compute_dtype)
        b_mat = w_hwio.reshape(C, O)
        out = _pallas_matmul_bias(a, b_mat, bias)
        return out.reshape(N, Ho, Wo, O)

    # ---- k x k conv --------------------------------------------------------
    x_pad = x_nhwc
    if ph or pw:
        x_pad = jnp.pad(x_nhwc, ((0, 0), (ph, ph), (pw, pw), (0, 0)))
    x_pad = x_pad.astype(compute_dtype)
    Hp, Wp = H + 2 * ph, W + 2 * pw

    _, _, budget, vmem_cap_limit, _ = _tpu_budgets()
    O_w, tO, nO = _choose_o_tiling(O)
    ab = jnp.dtype(compute_dtype).itemsize

    fused_bytes = (2 * Hp * Wp * C * ab             # image double-buffer
                   + 2 * kh * kw * C * tO * ab      # weight double-buffer
                   + 2 * Ho * Wo * tO * 4           # output double-buffer
                   + 2 * Ho * Wo * (tO + C) * 4)    # f32 acc + tap temporaries
    fused_ok = (sh == 1 and sw == 1 and Wo % 8 == 0
                and fused_bytes <= budget)

    if fused_ok:
        w_taps, bias_p = w_hwio, bias
        if O_w != O:
            w_taps = jnp.pad(w_taps, ((0, 0), (0, 0), (0, 0), (0, O_w - O)))
            bias_p = jnp.pad(bias_p, (0, O_w - O))
        bias_row = bias_p.reshape(1, O_w)

        vmem_limit = int(min(vmem_cap_limit, max(32 << 20, 2 * fused_bytes)))
        vmem_limit = int(min(vmem_cap_limit,
                             max(vmem_limit, fused_bytes + (4 << 20))))
        cost = pl.CostEstimate(
            flops=2 * N * Ho * Wo * kh * kw * C * O_w,
            transcendentals=0,
            bytes_accessed=(N * Hp * Wp * C * ab * nO
                            + N * kh * kw * C * O_w * ab
                            + N * Ho * Wo * O_w * 4))

        kern = functools.partial(_fused_conv_kernel, kh=kh, kw=kw, ho=Ho, wo=Wo)
        out = pl.pallas_call(
            kern,
            out_shape=jax.ShapeDtypeStruct((N, Ho, Wo, O_w), jnp.float32),
            grid_spec=pltpu.PrefetchScalarGridSpec(
                num_scalar_prefetch=0,
                grid=(N, nO),
                in_specs=[
                    pl.BlockSpec((1, Hp, Wp, C), lambda n, oj: (n, 0, 0, 0)),
                    pl.BlockSpec((kh, kw, C, tO), lambda n, oj: (0, 0, 0, oj)),
                    pl.BlockSpec((1, tO), lambda n, oj: (0, oj)),
                ],
                out_specs=pl.BlockSpec((1, Ho, Wo, tO),
                                       lambda n, oj: (n, 0, 0, oj))),
            compiler_params=pltpu.CompilerParams(
                dimension_semantics=("parallel", "parallel"),
                vmem_limit_bytes=vmem_limit),
            cost_estimate=cost,
        )(x_pad, w_taps, bias_row)
        if O_w != O:
            out = out[:, :, :, :O]
        return out

    # TODO(synk): fuse strided / VMEM-oversized convs too (manual DMA of
    # overlapping row slabs with pl.ANY input); until then fall back to an
    # XLA-built im2col feeding the Pallas matmul.
    taps = []
    for i in range(kh):
        for j in range(kw):
            taps.append(x_pad[:, i:i + sh * Ho:sh, j:j + sw * Wo:sw, :])
    cols = jnp.stack(taps, axis=3)                    # (N, Ho, Wo, kh*kw, C)
    a = cols.reshape(N * Ho * Wo, kh * kw * C)
    b_mat = w_hwio.reshape(kh * kw * C, O)
    out = _pallas_matmul_bias(a, b_mat, bias)
    return out.reshape(N, Ho, Wo, O)


def sn_conv2d_forward(x, weight, bias=None, *, stride=1, padding=0,
                      compute_dtype=jnp.bfloat16):
    """NCHW in / NCHW out (matches PyTorch SNConv2d.forward).  Prefer the
    NHWC entry point in NHWC pipelines: these two transposes are an extra
    full HBM read+write pass of activations/outputs done by XLA."""
    x_nhwc = jnp.transpose(x, (0, 2, 3, 1))
    out = sn_conv2d_forward_nhwc(x_nhwc, weight, bias, stride=stride,
                                 padding=padding, compute_dtype=compute_dtype)
    return jnp.transpose(out, (0, 3, 1, 2))


# ----------------------------------------------------------------------------
# Parameter init matching SNConv2d.__init__:
#   weight ~ xavier_uniform_(gain=1), bias ~ U(-1/sqrt(fan_in), 1/sqrt(fan_in))
# ----------------------------------------------------------------------------
def init_sn_conv2d_params(key, in_channels, out_channels, kernel_size=1):
    kh = kw = int(kernel_size)
    k_w, k_b = jax.random.split(key)
    fan_in = in_channels * kh * kw
    fan_out = out_channels * kh * kw
    limit = (6.0 / (fan_in + fan_out)) ** 0.5
    weight = jax.random.uniform(
        k_w, (out_channels, in_channels, kh, kw),
        minval=-limit, maxval=limit, dtype=jnp.float32)
    b_limit = 1.0 / (fan_in ** 0.5)
    bias = jax.random.uniform(
        k_b, (out_channels,), minval=-b_limit, maxval=b_limit,
        dtype=jnp.float32)
    return weight, bias


if __name__ == "__main__":
    key = jax.random.PRNGKey(0)
    k_x, k_p, k_x2, k_p2 = jax.random.split(key, 4)

    N, C_in, H, W = 2, 4, 16, 16
    C_out = 8

    # ---- Test 1: module defaults (1x1 conv), NCHW wrapper ------------------
    x = jax.random.normal(k_x, (N, C_in, H, W), dtype=jnp.float32)
    weight, bias = init_sn_conv2d_params(k_p, C_in, C_out, kernel_size=1)

    fwd = jax.jit(functools.partial(sn_conv2d_forward, stride=1, padding=0))
    out = fwd(x, weight, bias)
    jax.block_until_ready(out)
    assert out.shape == (N, C_out, H, W)

    ref = jax.lax.conv_general_dilated(
        x, weight, window_strides=(1, 1), padding=[(0, 0), (0, 0)],
        dimension_numbers=("NCHW", "OIHW", "NCHW"),
    ) + bias.reshape(1, C_out, 1, 1)
    err1 = float(jnp.max(jnp.abs(out - ref)))
    assert err1 < 5e-2, err1          # bf16 MXU feed vs f32 reference

    # ---- Test 2: 3x3 / pad 1 conv, fused-tap kernel, NHWC entry point ------
    x2 = jax.random.normal(k_x2, (N, H, W, C_in), dtype=jnp.float32)  # NHWC
    w2, b2 = init_sn_conv2d_params(k_p2, C_in, C_out, kernel_size=3)

    fwd2 = jax.jit(functools.partial(sn_conv2d_forward_nhwc,
                                     stride=1, padding=1))
    out2 = fwd2(x2, w2, b2)
    jax.block_until_ready(out2)
    assert out2.shape == (N, H, W, C_out)

    ref2 = jax.lax.conv_general_dilated(
        x2, jnp.transpose(w2, (2, 3, 1, 0)), window_strides=(1, 1),
        padding=[(1, 1), (1, 1)],
        dimension_numbers=("NHWC", "HWIO", "NHWC"),
    ) + b2.reshape(1, 1, 1, C_out)
    err2 = float(jnp.max(jnp.abs(out2 - ref2)))
    assert err2 < 5e-2, err2

    print("KERNEL_OK")
</pallas_src>

<mosaic_0001>
module attributes {stable_mosaic.version = 11 : i64} {
  func.func @_mm_bias_kernel(%arg0: i32, %arg1: i32, %arg2: memref<512x4xbf16, #tpu.memory_space<vmem>>, %arg3: memref<4x8xbf16, #tpu.memory_space<vmem>>, %arg4: memref<1x8xf32, #tpu.memory_space<vmem>>, %arg5: memref<512x8xf32, #tpu.memory_space<vmem>>) attributes {dimension_semantics = [#tpu.dimension_semantics<parallel>, #tpu.dimension_semantics<parallel>], iteration_bounds = array<i64: 1, 1>, scalar_prefetch = 0 : i64, scratch_operands = 0 : i64, tpu.core_type = #tpu.core_type<tc>, window_params = [{transform_indices = @transform_0, window_bounds = array<i64: 512, 4>}, {transform_indices = @transform_1, window_bounds = array<i64: 4, 8>}, {transform_indices = @transform_2, window_bounds = array<i64: 1, 8>}, {transform_indices = @transform_3, window_bounds = array<i64: 512, 8>}]} {
    %c0 = arith.constant 0 : index
    %c0_0 = arith.constant 0 : index
    %0 = vector.load %arg2[%c0, %c0_0] : memref<512x4xbf16, #tpu.memory_space<vmem>>, vector<512x4xbf16>
    %c0_1 = arith.constant 0 : index
    %c0_2 = arith.constant 0 : index
    %1 = vector.load %arg3[%c0_1, %c0_2] : memref<4x8xbf16, #tpu.memory_space<vmem>>, vector<4x8xbf16>
    %cst = arith.constant dense<0.000000e+00> : vector<512x8xf32>
    %2 = tpu.matmul %0, %1, %cst {dimension_numbers = #tpu.dot_dimension_numbers<[1], [0], [0], [1], [0, 0, 1, 1], [], []>} : vector<512x4xbf16>, vector<4x8xbf16>, vector<512x8xf32> -> vector<512x8xf32>
    %c0_3 = arith.constant 0 : index
    %c0_4 = arith.constant 0 : index
    %3 = vector.load %arg4[%c0_3, %c0_4] : memref<1x8xf32, #tpu.memory_space<vmem>>, vector<1x8xf32>
    %4 = vector.broadcast %3 : vector<1x8xf32> to vector<512x8xf32>
    %5 = arith.addf %2, %4 : vector<512x8xf32>
    %c0_5 = arith.constant 0 : index
    %c0_6 = arith.constant 0 : index
    %6 = vector.load %arg5[%c0_5, %c0_6] : memref<512x8xf32, #tpu.memory_space<vmem>>, vector<512x8xf32>
    tpu.vector_store %arg5[%c0_5, %c0_6], %5 {strides = array<i32>} : memref<512x8xf32, #tpu.memory_space<vmem>>, vector<512x8xf32>,
    return
  }
  func.func @transform_0(%arg0: i32, %arg1: i32) -> (i32, i32) {
    %c0_i32 = arith.constant 0 : i32
    %c0_i32_0 = arith.constant 0 : i32
    return %arg0, %c0_i32 : i32, i32
  }
  func.func @transform_1(%arg0: i32, %arg1: i32) -> (i32, i32) {
    %c0_i32 = arith.constant 0 : i32
    %c0_i32_0 = arith.constant 0 : i32
    return %c0_i32, %arg1 : i32, i32
  }
  func.func @transform_2(%arg0: i32, %arg1: i32) -> (i32, i32) {
    %c0_i32 = arith.constant 0 : i32
    %c0_i32_0 = arith.constant 0 : i32
    return %c0_i32, %arg1 : i32, i32
  }
  func.func @transform_3(%arg0: i32, %arg1: i32) -> (i32, i32) {
    %c0_i32 = arith.constant 0 : i32
    return %arg0, %arg1 : i32, i32
  }
}

</mosaic_0001>

<bundles_post_ra>
// kernel: sn_conv2d_forward.1
= control target key start
LH: loop header
LB: loop body
LE: loop exit
PB: predicated region body
PF: predicated region fallthrough
CT: control target
= control target key end

     0   :  { %vm341_vm0 = vcmask 1041408   ;;  %vm244_vm1 = vcmask 31744   ;;  %vm514_vm2 = vcmask 64512   ;;  %s1255_s1 = inlined_call_operand.vmem [shape: bf16[4,8], index: 1, kind: input, shape index: {}]   ;;  %s1256_s0 = inlined_call_operand.vmem [shape: bf16[512,4], index: 0, kind: input, shape index: {}]   ;;  %s1257_s2 = inlined_call_operand.vmem [shape: f32[1,8], index: 2, kind: input, shape index: {}]   ;;  %s1258_s3 = inlined_call_operand.vmem [shape: f32[512,8], index: 3, kind: output, shape index: {}]  }
   0x1   :  { %v79_v0 = vld [vmem:[%s1255_s1] sm:$0x3]  ;;  %v744_v6 = vld [vmem:[%s1256_s0 + $0x8] sm:$0xff]  ;;  %v745_v10 = vld [vmem:[%s1256_s0 + $0x10] sm:$0xff] }
   0x2   :  { %v343_v1 = vsel %vm341_vm0, %v79_v0, 0  ;;  %v743_v2 = vld [vmem:[%s1256_s0] sm:$0xff]  ;;  %v752_v7 = vld [vmem:[%s1256_s0 + $0x48] sm:$0xff]  ;;  %v753_v11 = vld [vmem:[%s1256_s0 + $0x50] sm:$0xff] }
   0x3   :  { %v751_v3 = vld [vmem:[%s1256_s0 + $0x40] sm:$0xff]  ;;  %352 = vmatpush.bf16.msra.mxu0 %v343_v1  ;;  %775 = vmatpush.bf16.msra.mxu1 %v343_v1  ;;  %v760_v8 = vld [vmem:[%s1256_s0 + $0x88] sm:$0xff]  ;;  %v761_v12 = vld [vmem:[%s1256_s0 + $0x90] sm:$0xff] }
   0x4   :  { %v759_v4 = vld [vmem:[%s1256_s0 + $0x80] sm:$0xff]  ;;  %776 = vmatpush.bf16.msra.mxu2 %v343_v1  ;;  %777 = vmatpush.bf16.msra.mxu3 %v343_v1  ;;  %v768_v9 = vld [vmem:[%s1256_s0 + $0xc8] sm:$0xff]  ;;  %v769_v13 = vld [vmem:[%s1256_s0 + $0xd0] sm:$0xff] }
   0x5   :  { %v767_v5 = vld [vmem:[%s1256_s0 + $0xc0] sm:$0xff]  ;;  %v746_v14 = vld [vmem:[%s1256_s0 + $0x18] sm:$0xff]  ;;  %v748_v22 = vld [vmem:[%s1256_s0 + $0x28] sm:$0xff] }
   0x6   :  { %711 = vmatmul.msk.bf16.vlgmr.msra.gmra.mxu0 %vm244_vm1, %v743_v2  ;;  %719 = vmatmul.msk.bf16.vlgmr.msra.gmra.mxu1 %vm244_vm1, %v751_v3  ;;  %v754_v15 = vld [vmem:[%s1256_s0 + $0x58] sm:$0xff]  ;;  %v747_v18 = vld [vmem:[%s1256_s0 + $0x20] sm:$0xff]  ;;  %v756_v23 = vld [vmem:[%s1256_s0 + $0x68] sm:$0xff] }
   0x7   :  { %727 = vmatmul.msk.bf16.vlgmr.msra.gmra.mxu2 %vm244_vm1, %v759_v4  ;;  %735 = vmatmul.msk.bf16.vlgmr.msra.gmra.mxu3 %vm244_vm1, %v767_v5  ;;  %v762_v16 = vld [vmem:[%s1256_s0 + $0x98] sm:$0xff]  ;;  %v755_v19 = vld [vmem:[%s1256_s0 + $0x60] sm:$0xff]  ;;  %v764_v24 = vld [vmem:[%s1256_s0 + $0xa8] sm:$0xff] }
   0x8   :  { %v770_v17 = vld [vmem:[%s1256_s0 + $0xd8] sm:$0xff]  ;;  %v763_v20 = vld [vmem:[%s1256_s0 + $0xa0] sm:$0xff]  ;;  %v772_v25 = vld [vmem:[%s1256_s0 + $0xe8] sm:$0xff] }
   0x9   :  { %v771_v21 = vld [vmem:[%s1256_s0 + $0xe0] sm:$0xff]  ;;  %v749_v26 = vld [vmem:[%s1256_s0 + $0x30] sm:$0xff]  ;;  %v750_v30 = vld [vmem:[%s1256_s0 + $0x38] sm:$0xff] }
   0xa   :  { %v757_v27 = vld [vmem:[%s1256_s0 + $0x70] sm:$0xff]  ;;  %v758_v31 = vld [vmem:[%s1256_s0 + $0x78] sm:$0xff]  ;;  %v933_v34 = vld [vmem:[%s1257_s2] ss:$0 sm:$0xff] }
   0xb   :  { %v765_v28 = vld [vmem:[%s1256_s0 + $0xb0] sm:$0xff]  ;;  %v766_v32 = vld [vmem:[%s1256_s0 + $0xb8] sm:$0xff] }
   0xc   :  { %v773_v29 = vld [vmem:[%s1256_s0 + $0xf0] sm:$0xff]  ;;  %v774_v33 = vld [vmem:[%s1256_s0 + $0xf8] sm:$0xff] }
  0x16   :  { %712 = vmatmul.msk.bf16.gmra.mxu0 %vm244_vm1, %v744_v6  ;;  %720 = vmatmul.msk.bf16.gmra.mxu1 %vm244_vm1, %v752_v7 }
  0x17   :  { %728 = vmatmul.msk.bf16.gmra.mxu2 %vm244_vm1, %v760_v8  ;;  %736 = vmatmul.msk.bf16.gmra.mxu3 %vm244_vm1, %v768_v9 }
  0x26   :  { %713 = vmatmul.msk.bf16.gmra.mxu0 %vm244_vm1, %v745_v10  ;;  %721 = vmatmul.msk.bf16.gmra.mxu1 %vm244_vm1, %v753_v11 }
  0x27   :  { %729 = vmatmul.msk.bf16.gmra.mxu2 %vm244_vm1, %v761_v12  ;;  %737 = vmatmul.msk.bf16.gmra.mxu3 %vm244_vm1, %v769_v13 }
  0x36   :  { %714 = vmatmul.msk.bf16.gmra.mxu0 %vm244_vm1, %v746_v14  ;;  %722 = vmatmul.msk.bf16.gmra.mxu1 %vm244_vm1, %v754_v15 }
  0x37   :  { %730 = vmatmul.msk.bf16.gmra.mxu2 %vm244_vm1, %v762_v16  ;;  %738 = vmatmul.msk.bf16.gmra.mxu3 %vm244_vm1, %v770_v17 }
  0x46   :  { %715 = vmatmul.msk.bf16.gmra.mxu0 %vm244_vm1, %v747_v18  ;;  %723 = vmatmul.msk.bf16.gmra.mxu1 %vm244_vm1, %v755_v19 }
  0x47   :  { %731 = vmatmul.msk.bf16.gmra.mxu2 %vm244_vm1, %v763_v20  ;;  %739 = vmatmul.msk.bf16.gmra.mxu3 %vm244_vm1, %v771_v21 }
  0x56   :  { %716 = vmatmul.msk.bf16.gmra.mxu0 %vm244_vm1, %v748_v22  ;;  %724 = vmatmul.msk.bf16.gmra.mxu1 %vm244_vm1, %v756_v23 }
  0x57   :  { %732 = vmatmul.msk.bf16.gmra.mxu2 %vm244_vm1, %v764_v24  ;;  %740 = vmatmul.msk.bf16.gmra.mxu3 %vm244_vm1, %v772_v25 }
  0x66   :  { %717 = vmatmul.msk.bf16.gmra.mxu0 %vm244_vm1, %v749_v26  ;;  %725 = vmatmul.msk.bf16.gmra.mxu1 %vm244_vm1, %v757_v27 }
  0x67   :  { %733 = vmatmul.msk.bf16.gmra.mxu2 %vm244_vm1, %v765_v28  ;;  %741 = vmatmul.msk.bf16.gmra.mxu3 %vm244_vm1, %v773_v29 }
  0x76   :  { %718 = vmatmul.msk.bf16.gmra.mxu0 %vm244_vm1, %v750_v30  ;;  %726 = vmatmul.msk.bf16.gmra.mxu1 %vm244_vm1, %v758_v31 }
  0x77   :  { %734 = vmatmul.msk.bf16.gmra.mxu2 %vm244_vm1, %v766_v32  ;;  %742 = vmatmul.msk.bf16.gmra.mxu3 %vm244_vm1, %v774_v33 }
  0x83   :  { %v354_v35 = vpop.f32.mrf.mxu0  ;;  %v394_v36 = vpop.f32.mrf.mxu1 }
  0x84   :  { %v355_v37 = vadd.f32 %v933_v34, %v354_v35  ;;  %v395_v38 = vadd.f32 %v933_v34, %v394_v36 }
  0x86   :  { %515 = vst.msk [vmem:[%s1258_s3] sm:$0xff] %vm514_vm2, %v355_v37 }
  0x87   :  { %531 = vst.msk [vmem:[%s1258_s3 + $0x80] sm:$0xff] %vm514_vm2, %v395_v38 }
  0x8a   :  { %v434_v39 = vpop.f32.mrf.mxu2  ;;  %v474_v40 = vpop.f32.mrf.mxu3 }
  0x8b   :  { %v435_v41 = vadd.f32 %v933_v34, %v434_v39  ;;  %v475_v42 = vadd.f32 %v933_v34, %v474_v40  ;;  %v356_v43 = vpop.f32.mrf.mxu0  ;;  %v396_v44 = vpop.f32.mrf.mxu1 }
  0x8c   :  { %v357_v45 = vadd.f32 %v933_v34, %v356_v43  ;;  %v397_v46 = vadd.f32 %v933_v34, %v396_v44 }
  0x8d   :  { %547 = vst.msk [vmem:[%s1258_s3 + $0x100] sm:$0xff] %vm514_vm2, %v435_v41 }
  0x8e   :  { %563 = vst.msk [vmem:[%s1258_s3 + $0x180] sm:$0xff] %vm514_vm2, %v475_v42 }
  0x8f   :  { %516 = vst.msk [vmem:[%s1258_s3 + $0x8] sm:$0xff] %vm514_vm2, %v357_v45 }
  0x90   :  { %532 = vst.msk [vmem:[%s1258_s3 + $0x88] sm:$0xff] %vm514_vm2, %v397_v46 }
  0x92   :  { %v436_v47 = vpop.f32.mrf.mxu2  ;;  %v476_v48 = vpop.f32.mrf.mxu3 }
  0x93   :  { %v437_v49 = vadd.f32 %v933_v34, %v436_v47  ;;  %v477_v50 = vadd.f32 %v933_v34, %v476_v48  ;;  %v359_v51 = vpop.f32.mrf.mxu0  ;;  %v399_v52 = vpop.f32.mrf.mxu1 }
  0x94   :  { %v360_v53 = vadd.f32 %v933_v34, %v359_v51  ;;  %v400_v54 = vadd.f32 %v933_v34, %v399_v52 }
  0x95   :  { %548 = vst.msk [vmem:[%s1258_s3 + $0x108] sm:$0xff] %vm514_vm2, %v437_v49 }
  0x96   :  { %564 = vst.msk [vmem:[%s1258_s3 + $0x188] sm:$0xff] %vm514_vm2, %v477_v50 }
  0x97   :  { %517 = vst.msk [vmem:[%s1258_s3 + $0x10] sm:$0xff] %vm514_vm2, %v360_v53 }
  0x98   :  { %533 = vst.msk [vmem:[%s1258_s3 + $0x90] sm:$0xff] %vm514_vm2, %v400_v54 }
  0x9a   :  { %v439_v55 = vpop.f32.mrf.mxu2  ;;  %v479_v56 = vpop.f32.mrf.mxu3 }
  0x9b   :  { %v440_v57 = vadd.f32 %v933_v34, %v439_v55  ;;  %v480_v58 = vadd.f32 %v933_v34, %v479_v56  ;;  %v361_v59 = vpop.f32.mrf.mxu0  ;;  %v401_v60 = vpop.f32.mrf.mxu1 }
  0x9c   :  { %v362_v61 = vadd.f32 %v933_v34, %v361_v59  ;;  %v402_v62 = vadd.f32 %v933_v34, %v401_v60 }
  0x9d   :  { %549 = vst.msk [vmem:[%s1258_s3 + $0x110] sm:$0xff] %vm514_vm2, %v440_v57 }
  0x9e   :  { %565 = vst.msk [vmem:[%s1258_s3 + $0x190] sm:$0xff] %vm514_vm2, %v480_v58 }
  0x9f   :  { %518 = vst.msk [vmem:[%s1258_s3 + $0x18] sm:$0xff] %vm514_vm2, %v362_v61 }
  0xa0   :  { %534 = vst.msk [vmem:[%s1258_s3 + $0x98] sm:$0xff] %vm514_vm2, %v402_v62 }
  0xa2   :  { %v441_v63 = vpop.f32.mrf.mxu2  ;;  %v481_v0 = vpop.f32.mrf.mxu3 }
  0xa3   :  { %v442_v1 = vadd.f32 %v933_v34, %v441_v63  ;;  %v482_v2 = vadd.f32 %v933_v34, %v481_v0  ;;  %v364_v3 = vpop.f32.mrf.mxu0  ;;  %v404_v4 = vpop.f32.mrf.mxu1 }
  0xa4   :  { %v365_v5 = vadd.f32 %v933_v34, %v364_v3  ;;  %v405_v6 = vadd.f32 %v933_v34, %v404_v4 }
  0xa5   :  { %550 = vst.msk [vmem:[%s1258_s3 + $0x118] sm:$0xff] %vm514_vm2, %v442_v1 }
  0xa6   :  { %566 = vst.msk [vmem:[%s1258_s3 + $0x198] sm:$0xff] %vm514_vm2, %v482_v2 }
  0xa7   :  { %519 = vst.msk [vmem:[%s1258_s3 + $0x20] sm:$0xff] %vm514_vm2, %v365_v5 }
  0xa8   :  { %535 = vst.msk [vmem:[%s1258_s3 + $0xa0] sm:$0xff] %vm514_vm2, %v405_v6 }
  0xaa   :  { %v444_v7 = vpop.f32.mrf.mxu2  ;;  %v484_v8 = vpop.f32.mrf.mxu3 }
  0xab   :  { %v445_v9 = vadd.f32 %v933_v34, %v444_v7  ;;  %v485_v10 = vadd.f32 %v933_v34, %v484_v8  ;;  %v366_v11 = vpop.f32.mrf.mxu0  ;;  %v406_v12 = vpop.f32.mrf.mxu1 }
  0xac   :  { %v367_v13 = vadd.f32 %v933_v34, %v366_v11  ;;  %v407_v14 = vadd.f32 %v933_v34, %v406_v12 }
  0xad   :  { %551 = vst.msk [vmem:[%s1258_s3 + $0x120] sm:$0xff] %vm514_vm2, %v445_v9 }
  0xae   :  { %567 = vst.msk [vmem:[%s1258_s3 + $0x1a0] sm:$0xff] %vm514_vm2, %v485_v10 }
  0xaf   :  { %520 = vst.msk [vmem:[%s1258_s3 + $0x28] sm:$0xff] %vm514_vm2, %v367_v13 }
  0xb0   :  { %536 = vst.msk [vmem:[%s1258_s3 + $0xa8] sm:$0xff] %vm514_vm2, %v407_v14 }
  0xb2   :  { %v446_v15 = vpop.f32.mrf.mxu2  ;;  %v486_v16 = vpop.f32.mrf.mxu3 }
  0xb3   :  { %v447_v17 = vadd.f32 %v933_v34, %v446_v15  ;;  %v487_v18 = vadd.f32 %v933_v34, %v486_v16  ;;  %v369_v19 = vpop.f32.mrf.mxu0  ;;  %v409_v20 = vpop.f32.mrf.mxu1 }
  0xb4   :  { %v370_v21 = vadd.f32 %v933_v34, %v369_v19  ;;  %v410_v22 = vadd.f32 %v933_v34, %v409_v20 }
  0xb5   :  { %552 = vst.msk [vmem:[%s1258_s3 + $0x128] sm:$0xff] %vm514_vm2, %v447_v17 }
  0xb6   :  { %568 = vst.msk [vmem:[%s1258_s3 + $0x1a8] sm:$0xff] %vm514_vm2, %v487_v18 }
  0xb7   :  { %521 = vst.msk [vmem:[%s1258_s3 + $0x30] sm:$0xff] %vm514_vm2, %v370_v21 }
  0xb8   :  { %537 = vst.msk [vmem:[%s1258_s3 + $0xb0] sm:$0xff] %vm514_vm2, %v410_v22 }
  0xba   :  { %v449_v23 = vpop.f32.mrf.mxu2  ;;  %v489_v24 = vpop.f32.mrf.mxu3 }
  0xbb   :  { %v450_v25 = vadd.f32 %v933_v34, %v449_v23  ;;  %v490_v26 = vadd.f32 %v933_v34, %v489_v24  ;;  %v371_v27 = vpop.f32.mrf.mxu0  ;;  %v411_v28 = vpop.f32.mrf.mxu1 }
  0xbc   :  { %v372_v29 = vadd.f32 %v933_v34, %v371_v27  ;;  %v412_v30 = vadd.f32 %v933_v34, %v411_v28 }
  0xbd   :  { %553 = vst.msk [vmem:[%s1258_s3 + $0x130] sm:$0xff] %vm514_vm2, %v450_v25 }
  0xbe   :  { %569 = vst.msk [vmem:[%s1258_s3 + $0x1b0] sm:$0xff] %vm514_vm2, %v490_v26 }
  0xbf   :  { %522 = vst.msk [vmem:[%s1258_s3 + $0x38] sm:$0xff] %vm514_vm2, %v372_v29 }
  0xc0   :  { %538 = vst.msk [vmem:[%s1258_s3 + $0xb8] sm:$0xff] %vm514_vm2, %v412_v30 }
  0xc2   :  { %v451_v31 = vpop.f32.mrf.mxu2  ;;  %v491_v32 = vpop.f32.mrf.mxu3 }
  0xc3   :  { %v452_v33 = vadd.f32 %v933_v34, %v451_v31  ;;  %v492_v35 = vadd.f32 %v933_v34, %v491_v32  ;;  %v374_v36 = vpop.f32.mrf.mxu0  ;;  %v414_v37 = vpop.f32.mrf.mxu1 }
  0xc4   :  { %v375_v38 = vadd.f32 %v933_v34, %v374_v36  ;;  %v415_v39 = vadd.f32 %v933_v34, %v414_v37 }
  0xc5   :  { %554 = vst.msk [vmem:[%s1258_s3 + $0x138] sm:$0xff] %vm514_vm2, %v452_v33 }
  0xc6   :  { %570 = vst.msk [vmem:[%s1258_s3 + $0x1b8] sm:$0xff] %vm514_vm2, %v492_v35 }
  0xc7   :  { %523 = vst.msk [vmem:[%s1258_s3 + $0x40] sm:$0xff] %vm514_vm2, %v375_v38 }
  0xc8   :  { %539 = vst.msk [vmem:[%s1258_s3 + $0xc0] sm:$0xff] %vm514_vm2, %v415_v39 }
  0xca   :  { %v454_v40 = vpop.f32.mrf.mxu2  ;;  %v494_v41 = vpop.f32.mrf.mxu3 }
  0xcb   :  { %v455_v42 = vadd.f32 %v933_v34, %v454_v40  ;;  %v495_v43 = vadd.f32 %v933_v34, %v494_v41  ;;  %v376_v44 = vpop.f32.mrf.mxu0  ;;  %v416_v45 = vpop.f32.mrf.mxu1 }
  0xcc   :  { %v377_v46 = vadd.f32 %v933_v34, %v376_v44  ;;  %v417_v47 = vadd.f32 %v933_v34, %v416_v45 }
  0xcd   :  { %555 = vst.msk [vmem:[%s1258_s3 + $0x140] sm:$0xff] %vm514_vm2, %v455_v42 }
  0xce   :  { %571 = vst.msk [vmem:[%s1258_s3 + $0x1c0] sm:$0xff] %vm514_vm2, %v495_v43 }
  0xcf   :  { %524 = vst.msk [vmem:[%s1258_s3 + $0x48] sm:$0xff] %vm514_vm2, %v377_v46 }
  0xd0   :  { %540 = vst.msk [vmem:[%s1258_s3 + $0xc8] sm:$0xff] %vm514_vm2, %v417_v47 }
  0xd2   :  { %v456_v48 = vpop.f32.mrf.mxu2  ;;  %v496_v49 = vpop.f32.mrf.mxu3 }
  0xd3   :  { %v457_v50 = vadd.f32 %v933_v34, %v456_v48  ;;  %v497_v51 = vadd.f32 %v933_v34, %v496_v49  ;;  %v379_v52 = vpop.f32.mrf.mxu0  ;;  %v419_v53 = vpop.f32.mrf.mxu1 }
  0xd4   :  { %v380_v54 = vadd.f32 %v933_v34, %v379_v52  ;;  %v420_v55 = vadd.f32 %v933_v34, %v419_v53 }
  0xd5   :  { %556 = vst.msk [vmem:[%s1258_s3 + $0x148] sm:$0xff] %vm514_vm2, %v457_v50 }
  0xd6   :  { %572 = vst.msk [vmem:[%s1258_s3 + $0x1c8] sm:$0xff] %vm514_vm2, %v497_v51 }
  0xd7   :  { %525 = vst.msk [vmem:[%s1258_s3 + $0x50] sm:$0xff] %vm514_vm2, %v380_v54 }
  0xd8   :  { %541 = vst.msk [vmem:[%s1258_s3 + $0xd0] sm:$0xff] %vm514_vm2, %v420_v55 }
  0xda   :  { %v459_v56 = vpop.f32.mrf.mxu2  ;;  %v499_v57 = vpop.f32.mrf.mxu3 }
  0xdb   :  { %v460_v58 = vadd.f32 %v933_v34, %v459_v56  ;;  %v500_v59 = vadd.f32 %v933_v34, %v499_v57  ;;  %v381_v60 = vpop.f32.mrf.mxu0  ;;  %v421_v61 = vpop.f32.mrf.mxu1 }
  0xdc   :  { %v382_v62 = vadd.f32 %v933_v34, %v381_v60  ;;  %v422_v63 = vadd.f32 %v933_v34, %v421_v61 }
  0xdd   :  { %557 = vst.msk [vmem:[%s1258_s3 + $0x150] sm:$0xff] %vm514_vm2, %v460_v58 }
  0xde   :  { %573 = vst.msk [vmem:[%s1258_s3 + $0x1d0] sm:$0xff] %vm514_vm2, %v500_v59 }
  0xdf   :  { %526 = vst.msk [vmem:[%s1258_s3 + $0x58] sm:$0xff] %vm514_vm2, %v382_v62 }
  0xe0   :  { %542 = vst.msk [vmem:[%s1258_s3 + $0xd8] sm:$0xff] %vm514_vm2, %v422_v63 }
  0xe2   :  { %v461_v0 = vpop.f32.mrf.mxu2  ;;  %v501_v1 = vpop.f32.mrf.mxu3 }
  0xe3   :  { %v462_v2 = vadd.f32 %v933_v34, %v461_v0  ;;  %v502_v3 = vadd.f32 %v933_v34, %v501_v1  ;;  %v384_v4 = vpop.f32.mrf.mxu0  ;;  %v424_v5 = vpop.f32.mrf.mxu1 }
  0xe4   :  { %v385_v6 = vadd.f32 %v933_v34, %v384_v4  ;;  %v425_v7 = vadd.f32 %v933_v34, %v424_v5 }
  0xe5   :  { %558 = vst.msk [vmem:[%s1258_s3 + $0x158] sm:$0xff] %vm514_vm2, %v462_v2 }
  0xe6   :  { %574 = vst.msk [vmem:[%s1258_s3 + $0x1d8] sm:$0xff] %vm514_vm2, %v502_v3 }
  0xe7   :  { %527 = vst.msk [vmem:[%s1258_s3 + $0x60] sm:$0xff] %vm514_vm2, %v385_v6 }
  0xe8   :  { %543 = vst.msk [vmem:[%s1258_s3 + $0xe0] sm:$0xff] %vm514_vm2, %v425_v7 }
  0xea   :  { %v464_v8 = vpop.f32.mrf.mxu2  ;;  %v504_v9 = vpop.f32.mrf.mxu3 }
  0xeb   :  { %v465_v10 = vadd.f32 %v933_v34, %v464_v8  ;;  %v505_v11 = vadd.f32 %v933_v34, %v504_v9  ;;  %v386_v12 = vpop.f32.mrf.mxu0  ;;  %v426_v13 = vpop.f32.mrf.mxu1 }
  0xec   :  { %v387_v14 = vadd.f32 %v933_v34, %v386_v12  ;;  %v427_v15 = vadd.f32 %v933_v34, %v426_v13 }
  0xed   :  { %559 = vst.msk [vmem:[%s1258_s3 + $0x160] sm:$0xff] %vm514_vm2, %v465_v10 }
  0xee   :  { %575 = vst.msk [vmem:[%s1258_s3 + $0x1e0] sm:$0xff] %vm514_vm2, %v505_v11 }
  0xef   :  { %528 = vst.msk [vmem:[%s1258_s3 + $0x68] sm:$0xff] %vm514_vm2, %v387_v14 }
  0xf0   :  { %544 = vst.msk [vmem:[%s1258_s3 + $0xe8] sm:$0xff] %vm514_vm2, %v427_v15 }
  0xf2   :  { %v466_v16 = vpop.f32.mrf.mxu2  ;;  %v506_v17 = vpop.f32.mrf.mxu3 }
  0xf3   :  { %v467_v18 = vadd.f32 %v933_v34, %v466_v16  ;;  %v507_v19 = vadd.f32 %v933_v34, %v506_v17  ;;  %v389_v20 = vpop.f32.mrf.mxu0  ;;  %v429_v21 = vpop.f32.mrf.mxu1 }
  0xf4   :  { %v390_v22 = vadd.f32 %v933_v34, %v389_v20  ;;  %v430_v23 = vadd.f32 %v933_v34, %v429_v21 }
  0xf5   :  { %560 = vst.msk [vmem:[%s1258_s3 + $0x168] sm:$0xff] %vm514_vm2, %v467_v18 }
  0xf6   :  { %576 = vst.msk [vmem:[%s1258_s3 + $0x1e8] sm:$0xff] %vm514_vm2, %v507_v19 }
  0xf7   :  { %529 = vst.msk [vmem:[%s1258_s3 + $0x70] sm:$0xff] %vm514_vm2, %v390_v22 }
  0xf8   :  { %545 = vst.msk [vmem:[%s1258_s3 + $0xf0] sm:$0xff] %vm514_vm2, %v430_v23 }
  0xfa   :  { %v469_v24 = vpop.f32.mrf.mxu2  ;;  %v509_v25 = vpop.f32.mrf.mxu3 }
  0xfb   :  { %v470_v26 = vadd.f32 %v933_v34, %v469_v24  ;;  %v510_v27 = vadd.f32 %v933_v34, %v509_v25  ;;  %v391_v28 = vpop.f32.mrf.mxu0  ;;  %v431_v29 = vpop.f32.mrf.mxu1 }
  0xfc   :  { %v392_v30 = vadd.f32 %v933_v34, %v391_v28  ;;  %v432_v31 = vadd.f32 %v933_v34, %v431_v29 }
  0xfd   :  { %561 = vst.msk [vmem:[%s1258_s3 + $0x170] sm:$0xff] %vm514_vm2, %v470_v26 }
  0xfe   :  { %577 = vst.msk [vmem:[%s1258_s3 + $0x1f0] sm:$0xff] %vm514_vm2, %v510_v27 }
  0xff   :  { %530 = vst.msk [vmem:[%s1258_s3 + $0x78] sm:$0xff] %vm514_vm2, %v392_v30 }
 0x100   :  { %546 = vst.msk [vmem:[%s1258_s3 + $0xf8] sm:$0xff] %vm514_vm2, %v432_v31 }
 0x102   :  { %v471_v32 = vpop.f32.mrf.mxu2  ;;  %v511_v33 = vpop.f32.mrf.mxu3 }
 0x103   :  { %v472_v35 = vadd.f32 %v933_v34, %v471_v32  ;;  %v512_v36 = vadd.f32 %v933_v34, %v511_v33 }
 0x105   :  { %562 = vst.msk [vmem:[%s1258_s3 + $0x178] sm:$0xff] %vm514_vm2, %v472_v35 }
 0x106   :  { %578 = vst.msk [vmem:[%s1258_s3 + $0x1f8] sm:$0xff] %vm514_vm2, %v512_v36 }

</bundles_post_ra>
